<compile_context>
chip_gen: v5e
topology: v5e:2x2
jax: 0.10.0
libtpu: 0.0.40
codegen_flags: <defaults>
</compile_context>

<pallas_src>
import functools
import math

import jax
import jax.numpy as jnp
from jax import lax
from jax.experimental import pallas as pl
from jax.experimental.pallas import tpu as pltpu


# -----------------------------------------------------------------------------
# Activations (f32 math inside the kernel).
# -----------------------------------------------------------------------------
def _apply_act(x, act):
    if act in ("none", "identity", None):
        return x
    if act == "silu":
        return x * jax.nn.sigmoid(x)
    if act == "relu":
        return jnp.maximum(x, 0.0)
    if act == "gelu":
        # PyTorch F.gelu default is exact (erf), not tanh-approx.
        return jax.nn.gelu(x, approximate=False)
    if act == "sigmoid":
        return jax.nn.sigmoid(x)
    raise ValueError(f"unsupported act: {act}")


def _round_up(x, m):
    return (x + m - 1) // m * m


def _sublane_align(dtype):
    # Minimum second-minor tile: f32 -> 8, bf16 -> 16, int8/fp8 -> 32.
    return max(8, 32 // jnp.dtype(dtype).itemsize)


def _tpu_defaults():
    """Per-generation tile defaults and a conservative VMEM budget (bytes)."""
    kind = ""
    try:
        kind = jax.devices()[0].device_kind.lower()
    except Exception:
        pass
    tm, tn, tk = 256, 256, 512
    vmem_budget = 64 << 20                       # v6e / v5p: 128 MiB physical
    if ("v2" in kind) or ("v3" in kind):
        tm, tn, tk = 128, 128, 256
        vmem_budget = 10 << 20
    elif ("v4" in kind) or ("v5 lite" in kind) or ("v5e" in kind) or ("v5lite" in kind):
        tn, tk = 128, 256                        # 128-wide MXU, ease vst pressure
        vmem_budget = 56 << 20
    elif "7" in kind:                            # TPU7x: 64 MiB VMEM per TC
        vmem_budget = 40 << 20
    return tm, tn, tk, vmem_budget


# -----------------------------------------------------------------------------
# Kernel body.
#   refs: x1 (tm,tk), x2 (tm,tk), w (tn,tk), [bias (1,tn)], [res (tm,tn)],
#         out (tm,tn), acc scratch (tm,tn) f32,
#         [g cache scratch (cache_slots, tm, tk) in the MXU dtype]
# -----------------------------------------------------------------------------
def _gate_linear_kernel(*refs, act, has_bias, has_residual, n_cache, use_cache,
                        mxu_dtype):
    it = iter(refs)
    x1_ref = next(it)
    x2_ref = next(it)
    w_ref = next(it)
    b_ref = next(it) if has_bias else None
    res_ref = next(it) if has_residual else None
    o_ref = next(it)
    acc_ref = next(it)
    g_ref = next(it) if use_cache else None

    j = pl.program_id(1)          # N-tile index
    k = pl.program_id(2)          # K-tile index (reduction, innermost)
    nk = pl.num_programs(2)

    @pl.when(k == 0)
    def _():
        acc_ref[...] = jnp.zeros_like(acc_ref)

    if use_cache:
        # Slots [0, n_cache) persist per (M-tile, K-tile) and are filled on the
        # first N-tile pass (j == 0); slot n_cache is a scratch slot recomputed
        # for K-tiles that did not fit in the VMEM budget.
        # NOTE: correctness relies on j==0 running before j>0 for each M-tile,
        # which holds because the N grid axis is marked "arbitrary" below.
        slot = jnp.minimum(k, n_cache)

        @pl.when(jnp.logical_or(j == 0, k >= n_cache))
        def _():
            x1 = x1_ref[...].astype(jnp.float32)
            x2 = x2_ref[...].astype(jnp.float32)
            g_ref[slot] = (_apply_act(x1, act) * x2).astype(g_ref.dtype)

        g = g_ref[slot]                               # (tm, tk), MXU dtype
    else:
        x1 = x1_ref[...].astype(jnp.float32)
        x2 = x2_ref[...].astype(jnp.float32)
        g = (_apply_act(x1, act) * x2).astype(mxu_dtype)

    w = w_ref[...].astype(mxu_dtype)                  # (tn, tk), no transpose
    # Keep the accumulate adjacent to the matmul (no intervening ops) so Mosaic
    # can keep partials in the MXU result buffer (MRB on v7x).
    acc_ref[...] += lax.dot_general(
        g, w,
        dimension_numbers=(((1,), (1,)), ((), ())),   # A @ B.T, MXU-native
        preferred_element_type=jnp.float32)

    @pl.when(k == nk - 1)
    def _():
        y = acc_ref[...]
        if has_bias:
            y = y + b_ref[...].astype(jnp.float32)
        if has_residual:
            y = y + res_ref[...].astype(jnp.float32)
        o_ref[...] = y.astype(o_ref.dtype)


# -----------------------------------------------------------------------------
# Wrapper.
# -----------------------------------------------------------------------------
def gate_linear(x1, x2, weight, bias, act="silu", residual=None, *,
                tm=None, tn=None, tk=None):
    """Pallas implementation of gate_linear_fn.

    x1, x2:   (..., K)
    weight:   (N, K)   -- PyTorch nn.Linear layout
    bias:     (N,) or None
    residual: (..., N) or None
    """
    assert x1.shape == x2.shape, "x1/x2 shape mismatch"
    *lead, K = x1.shape
    N, Kw = weight.shape
    assert K == Kw, "in_features mismatch"

    for a in (x1, x2, weight):
        if jnp.issubdtype(a.dtype, jnp.integer):
            # TODO(synk): int8 would need explicit scales; v7x MXU has no int path.
            raise NotImplementedError("integer inputs are not supported")

    M = math.prod(lead) if lead else 1
    has_bias = bias is not None
    has_residual = residual is not None
    if has_residual:
        assert residual.shape == tuple(lead) + (N,)

    out_dtype = x1.dtype
    # MXU operand dtype (native low precision; accumulation stays f32).
    mxu_dtype = jnp.promote_types(x1.dtype, weight.dtype)

    tm_d, tn_d, tk_d, vmem_budget = _tpu_defaults()
    tm = tm_d if tm is None else tm
    tn = tn_d if tn is None else tn
    tk = tk_d if tk is None else tk

    sub_m = max(_sublane_align(x1.dtype), _sublane_align(out_dtype),
                _sublane_align(residual.dtype) if has_residual else 8)

    # M tiling: rebalance so >=2 M-tiles exist when possible (keeps both
    # TensorCores busy on v7x/megacore for small-batch shapes) and padding
    # stays minimal.
    M_al = _round_up(M, sub_m)
    nm = pl.cdiv(M, max(_round_up(tm, sub_m), sub_m))
    if nm == 1 and M_al > sub_m:
        nm = 2
    tm = _round_up(pl.cdiv(M, nm), sub_m)
    M_p = nm * tm

    tn = min(max(128, _round_up(tn, 128)), _round_up(N, 128))
    tk = min(max(128, _round_up(tk, 128)), _round_up(K, 128))
    N_p = _round_up(N, tn)
    K_p = _round_up(K, tk)
    nj, nk = N_p // tn, K_p // tk
    grid_m = M_p // tm

    x_item = jnp.dtype(x1.dtype).itemsize
    w_item = jnp.dtype(weight.dtype).itemsize
    out_item = jnp.dtype(out_dtype).itemsize
    mxu_item = jnp.dtype(mxu_dtype).itemsize
    res_item = jnp.dtype(residual.dtype).itemsize if has_residual else 0
    bias_item = jnp.dtype(bias.dtype).itemsize if has_bias else 0

    # --- VMEM accounting: fixed (double-buffered) tiles + bounded gating cache.
    fixed = (2 * 2 * tm * tk * x_item            # x1, x2 tiles (double-buffered)
             + 2 * tn * tk * w_item              # weight tile
             + 2 * tm * tn * out_item            # output tile
             + tm * tn * 4)                      # f32 accumulator
    if has_bias:
        fixed += 2 * 8 * tn * bias_item
    if has_residual:
        fixed += 2 * tm * tn * res_item

    per_slot = tm * tk * mxu_item
    avail = max(0, vmem_budget - fixed - (2 << 20))
    slots_afford = int(avail // per_slot)

    if nj > 1 and slots_afford >= 2:
        use_cache = True
        if slots_afford >= nk:
            n_cache, cache_slots = nk, nk        # fully cached
        else:
            cache_slots = slots_afford           # capped: recompute past the cap
            n_cache = cache_slots - 1
    else:
        # Single N-tile (gating computed exactly once anyway) or VMEM-starved
        # fallback: recompute gating in registers, no cache scratch.
        use_cache = False
        n_cache, cache_slots = 0, 0

    cache_bytes = cache_slots * per_slot
    vmem_limit = int(min(vmem_budget + (16 << 20),
                         max(32 << 20, fixed + cache_bytes + (8 << 20))))

    # Zero padding is exact: padded x2 columns are 0, so g = act(x1)*x2 = 0
    # there for every supported act, and padded weight rows/cols are 0 too.
    # Skipped entirely when the shapes are already tile-aligned.
    def pad2(a, r, c):
        R, C = a.shape
        return a if (R, C) == (r, c) else jnp.pad(a, ((0, r - R), (0, c - C)))

    x1f = pad2(x1.reshape(M, K), M_p, K_p)
    x2f = pad2(x2.reshape(M, K), M_p, K_p)
    wf = pad2(weight, N_p, K_p)

    frozen_k = nk - 1
    if use_cache:
        def x_index_map(i, j, k):
            # Only fetch x1/x2 when the kernel actually reads them (first
            # N-tile pass, or K-tiles beyond the cache cap). Otherwise return
            # the previously fetched block index so Pallas skips the DMA.
            fetch = jnp.logical_or(j == 0, k >= n_cache)
            return (i, jnp.where(fetch, k, frozen_k))
    else:
        def x_index_map(i, j, k):
            return (i, k)

    args = [x1f, x2f, wf]
    in_specs = [
        pl.BlockSpec((tm, tk), x_index_map),                   # x1 tile
        pl.BlockSpec((tm, tk), x_index_map),                   # x2 tile
        pl.BlockSpec((tn, tk), lambda i, j, k: (j, k)),        # weight tile
    ]
    if has_bias:
        args.append(pad2(bias.reshape(1, N), 1, N_p))
        in_specs.append(pl.BlockSpec((1, tn), lambda i, j, k: (0, j)))
    if has_residual:
        args.append(pad2(residual.reshape(M, N), M_p, N_p))
        in_specs.append(pl.BlockSpec((tm, tn), lambda i, j, k: (i, j)))

    scratch_shapes = [pltpu.VMEM((tm, tn), jnp.float32)]       # f32 accumulator
    if use_cache:
        scratch_shapes.append(pltpu.VMEM((cache_slots, tm, tk), mxu_dtype))

    # Advisory cost estimate reflecting the actual HBM traffic.
    if use_cache:
        x_bytes = 2 * M_p * tk * (nk + (nj - 1) * (nk - n_cache)) * x_item
    else:
        x_bytes = 2 * M_p * K_p * nj * x_item
    bytes_accessed = int(x_bytes
                         + grid_m * N_p * K_p * w_item
                         + M_p * N_p * out_item
                         + (M_p * N_p * res_item if has_residual else 0)
                         + (grid_m * N_p * bias_item if has_bias else 0))
    transcendentals = M_p * K_p if act in ("silu", "sigmoid", "gelu") else 0

    out = pl.pallas_call(
        functools.partial(_gate_linear_kernel, act=act, has_bias=has_bias,
                          has_residual=has_residual, n_cache=n_cache,
                          use_cache=use_cache, mxu_dtype=mxu_dtype),
        out_shape=jax.ShapeDtypeStruct((M_p, N_p), out_dtype),
        grid_spec=pltpu.PrefetchScalarGridSpec(
            num_scalar_prefetch=0,
            grid=(grid_m, nj, nk),
            in_specs=in_specs,
            out_specs=pl.BlockSpec((tm, tn), lambda i, j, k: (i, j)),
            scratch_shapes=scratch_shapes,
        ),
        compiler_params=pltpu.CompilerParams(
            # M-tiles are independent -> megacore sharding. N must stay
            # "arbitrary" while the gating cache is active (j==0 must run
            # before j>0 for each M-tile); K is the reduction axis.
            dimension_semantics=("parallel",
                                 "arbitrary" if use_cache else "parallel",
                                 "arbitrary"),
            vmem_limit_bytes=vmem_limit,
        ),
        cost_estimate=pl.CostEstimate(
            flops=int(2 * M_p * N_p * K_p),
            transcendentals=int(transcendentals),
            bytes_accessed=bytes_accessed,
        ),
    )(*args)

    if (M_p, N_p) != (M, N):
        out = out[:M, :N]
    return out.reshape(*lead, N)


# -----------------------------------------------------------------------------
# Pure-JAX reference (mirrors the PyTorch gate_linear_fn).
# -----------------------------------------------------------------------------
def gate_linear_ref(x1, x2, weight, bias, act="silu", residual=None):
    g = _apply_act(x1.astype(jnp.float32), act) * x2.astype(jnp.float32)
    y = g @ weight.astype(jnp.float32).T
    if bias is not None:
        y = y + bias.astype(jnp.float32)
    if residual is not None:
        y = y + residual.astype(jnp.float32)
    return y.astype(x1.dtype)


if __name__ == "__main__":
    # ---- Case 1: small token-stream GLU shapes (B, S, D). --------------------
    B, S, D_in, D_out = 2, 8, 32, 32
    key = jax.random.PRNGKey(0)
    k1, k2, k3, k4, k5 = jax.random.split(key, 5)

    x1 = jax.random.normal(k1, (B, S, D_in), dtype=jnp.float32)
    x2 = jax.random.normal(k2, (B, S, D_in), dtype=jnp.float32)
    weight = jax.random.normal(k3, (D_out, D_in), dtype=jnp.float32) * 0.05
    bias = jax.random.normal(k4, (D_out,), dtype=jnp.float32) * 0.01
    residual = jax.random.normal(k5, (B, S, D_out), dtype=jnp.float32)

    out = jax.block_until_ready(
        gate_linear(x1, x2, weight, bias, act="silu", residual=residual))
    ref = gate_linear_ref(x1, x2, weight, bias, act="silu", residual=residual)
    assert out.shape == (B, S, D_out)
    assert jnp.allclose(out, ref, atol=1e-4, rtol=1e-4), "mismatch (residual path)"

    out2 = jax.block_until_ready(
        gate_linear(x1, x2, weight, bias, act="silu", residual=None))
    ref2 = gate_linear_ref(x1, x2, weight, bias, act="silu", residual=None)
    assert jnp.allclose(out2, ref2, atol=1e-4, rtol=1e-4), "mismatch (no-residual path)"

    # ---- Case 2: multiple K- and N-tiles (exercises the gating cache, frozen
    #      x1/x2 index maps and non-aligned-extent padding). -------------------
    M2, K2, N2 = 48, 640, 640
    q1, q2, q3, q4, q5 = jax.random.split(jax.random.PRNGKey(1), 5)
    y1 = jax.random.normal(q1, (M2, K2), dtype=jnp.float32)
    y2 = jax.random.normal(q2, (M2, K2), dtype=jnp.float32)
    w2 = jax.random.normal(q3, (N2, K2), dtype=jnp.float32) * 0.02
    b2 = jax.random.normal(q4, (N2,), dtype=jnp.float32) * 0.01
    r2 = jax.random.normal(q5, (M2, N2), dtype=jnp.float32)
    out3 = jax.block_until_ready(
        gate_linear(y1, y2, w2, b2, act="silu", residual=r2))
    ref3 = gate_linear_ref(y1, y2, w2, b2, act="silu", residual=r2)
    assert jnp.allclose(out3, ref3, atol=5e-3, rtol=5e-3), "mismatch (tiled path)"

    # ---- Case 3: bf16 path — MXU fed native bf16 operands, f32 accumulation.
    # (The gate is intentionally quantized to bf16 before the MXU.)
    x1b = x1.astype(jnp.bfloat16)
    x2b = x2.astype(jnp.bfloat16)
    wb = weight.astype(jnp.bfloat16)
    bb = bias.astype(jnp.bfloat16)
    rb = residual.astype(jnp.bfloat16)
    outb = jax.block_until_ready(
        gate_linear(x1b, x2b, wb, bb, act="silu", residual=rb))
    refb = gate_linear_ref(x1b, x2b, wb, bb, act="silu", residual=rb)
    assert jnp.allclose(outb.astype(jnp.float32), refb.astype(jnp.float32),
                        atol=5e-2, rtol=5e-2), "mismatch (bf16 path)"

    print("KERNEL_OK")
</pallas_src>

<mosaic_0001>
module attributes {stable_mosaic.version = 11 : i64} {
  func.func @_gate_linear_kernel(%arg0: i32, %arg1: i32, %arg2: i32, %arg3: memref<8x128xf32, #tpu.memory_space<vmem>>, %arg4: memref<8x128xf32, #tpu.memory_space<vmem>>, %arg5: memref<128x128xf32, #tpu.memory_space<vmem>>, %arg6: memref<1x128xf32, #tpu.memory_space<vmem>>, %arg7: memref<8x128xf32, #tpu.memory_space<vmem>>, %arg8: memref<8x128xf32, #tpu.memory_space<vmem>>, %arg9: memref<8x128xf32, #tpu.memory_space<vmem>>) attributes {dimension_semantics = [#tpu.dimension_semantics<parallel>, #tpu.dimension_semantics<parallel>, #tpu.dimension_semantics<arbitrary>], iteration_bounds = array<i64: 2, 1, 1>, scalar_prefetch = 0 : i64, scratch_operands = 1 : i64, tpu.core_type = #tpu.core_type<tc>, window_params = [{transform_indices = @transform_0, window_bounds = array<i64: 8, 128>}, {transform_indices = @transform_1, window_bounds = array<i64: 8, 128>}, {transform_indices = @transform_2, window_bounds = array<i64: 128, 128>}, {transform_indices = @transform_3, window_bounds = array<i64: 1, 128>}, {transform_indices = @transform_4, window_bounds = array<i64: 8, 128>}, {transform_indices = @transform_5, window_bounds = array<i64: 8, 128>}]} {
    %c0_i32 = arith.constant 0 : i32
    %0 = arith.cmpi eq, %arg2, %c0_i32 : i32
    %1 = arith.extui %0 : i1 to i32
    %c0_i32_0 = arith.constant 0 : i32
    %2 = arith.cmpi ne, %1, %c0_i32_0 : i32
    scf.if %2 {
      %cst_13 = arith.constant 0.000000e+00 : f32
      %20 = vector.broadcast %cst_13 : f32 to vector<8x128xf32>
      %c0_14 = arith.constant 0 : index
      %c0_15 = arith.constant 0 : index
      %21 = vector.load %arg9[%c0_14, %c0_15] : memref<8x128xf32, #tpu.memory_space<vmem>>, vector<8x128xf32>
      tpu.vector_store %arg9[%c0_14, %c0_15], %20 {strides = array<i32>} : memref<8x128xf32, #tpu.memory_space<vmem>>, vector<8x128xf32>,
    } else {
    }
    %c0 = arith.constant 0 : index
    %c0_1 = arith.constant 0 : index
    %3 = vector.load %arg3[%c0, %c0_1] : memref<8x128xf32, #tpu.memory_space<vmem>>, vector<8x128xf32>
    %c0_2 = arith.constant 0 : index
    %c0_3 = arith.constant 0 : index
    %4 = vector.load %arg4[%c0_2, %c0_3] : memref<8x128xf32, #tpu.memory_space<vmem>>, vector<8x128xf32>
    %5 = arith.negf %3 : vector<8x128xf32>
    %6 = math.exp %5 : vector<8x128xf32>
    %cst = arith.constant 1.000000e+00 : f32
    %7 = vector.broadcast %cst : f32 to vector<8x128xf32>
    %8 = arith.addf %7, %6 : vector<8x128xf32>
    %9 = arith.divf %7, %8 : vector<8x128xf32>
    %10 = arith.mulf %3, %9 : vector<8x128xf32>
    %11 = arith.mulf %10, %4 : vector<8x128xf32>
    %c0_4 = arith.constant 0 : index
    %c0_5 = arith.constant 0 : index
    %12 = vector.load %arg5[%c0_4, %c0_5] : memref<128x128xf32, #tpu.memory_space<vmem>>, vector<128x128xf32>
    %c0_6 = arith.constant 0 : index
    %c0_7 = arith.constant 0 : index
    %13 = vector.load %arg9[%c0_6, %c0_7] : memref<8x128xf32, #tpu.memory_space<vmem>>, vector<8x128xf32>
    %cst_8 = arith.constant dense<0.000000e+00> : vector<8x128xf32>
    %14 = tpu.matmul %11, %12, %cst_8 {dimension_numbers = #tpu.dot_dimension_numbers<[1], [1], [0], [0], [0, 0, 1, 0], [], []>} : vector<8x128xf32>, vector<128x128xf32>, vector<8x128xf32> -> vector<8x128xf32>
    %15 = arith.addf %13, %14 : vector<8x128xf32>
    %c0_9 = arith.constant 0 : index
    %c0_10 = arith.constant 0 : index
    %16 = vector.load %arg9[%c0_9, %c0_10] : memref<8x128xf32, #tpu.memory_space<vmem>>, vector<8x128xf32>
    tpu.vector_store %arg9[%c0_9, %c0_10], %15 {strides = array<i32>} : memref<8x128xf32, #tpu.memory_space<vmem>>, vector<8x128xf32>,
    %c0_i32_11 = arith.constant 0 : i32
    %17 = arith.cmpi eq, %arg2, %c0_i32_11 : i32
    %18 = arith.extui %17 : i1 to i32
    %c0_i32_12 = arith.constant 0 : i32
    %19 = arith.cmpi ne, %18, %c0_i32_12 : i32
    scf.if %19 {
      %c0_13 = arith.constant 0 : index
      %c0_14 = arith.constant 0 : index
      %20 = vector.load %arg9[%c0_13, %c0_14] : memref<8x128xf32, #tpu.memory_space<vmem>>, vector<8x128xf32>
      %c0_15 = arith.constant 0 : index
      %c0_16 = arith.constant 0 : index
      %21 = vector.load %arg6[%c0_15, %c0_16] : memref<1x128xf32, #tpu.memory_space<vmem>>, vector<1x128xf32>
      %22 = vector.broadcast %21 : vector<1x128xf32> to vector<8x128xf32>
      %23 = arith.addf %20, %22 : vector<8x128xf32>
      %c0_17 = arith.constant 0 : index
      %c0_18 = arith.constant 0 : index
      %24 = vector.load %arg7[%c0_17, %c0_18] : memref<8x128xf32, #tpu.memory_space<vmem>>, vector<8x128xf32>
      %25 = arith.addf %23, %24 : vector<8x128xf32>
      %c0_19 = arith.constant 0 : index
      %c0_20 = arith.constant 0 : index
      %26 = vector.load %arg8[%c0_19, %c0_20] : memref<8x128xf32, #tpu.memory_space<vmem>>, vector<8x128xf32>
      tpu.vector_store %arg8[%c0_19, %c0_20], %25 {strides = array<i32>} : memref<8x128xf32, #tpu.memory_space<vmem>>, vector<8x128xf32>,
    } else {
    }
    return
  }
  func.func @transform_0(%arg0: i32, %arg1: i32, %arg2: i32) -> (i32, i32) {
    %c0_i32 = arith.constant 0 : i32
    return %arg0, %arg2 : i32, i32
  }
  func.func @transform_1(%arg0: i32, %arg1: i32, %arg2: i32) -> (i32, i32) {
    %c0_i32 = arith.constant 0 : i32
    return %arg0, %arg2 : i32, i32
  }
  func.func @transform_2(%arg0: i32, %arg1: i32, %arg2: i32) -> (i32, i32) {
    %c0_i32 = arith.constant 0 : i32
    return %arg1, %arg2 : i32, i32
  }
  func.func @transform_3(%arg0: i32, %arg1: i32, %arg2: i32) -> (i32, i32) {
    %c0_i32 = arith.constant 0 : i32
    %c0_i32_0 = arith.constant 0 : i32
    return %c0_i32, %arg1 : i32, i32
  }
  func.func @transform_4(%arg0: i32, %arg1: i32, %arg2: i32) -> (i32, i32) {
    %c0_i32 = arith.constant 0 : i32
    return %arg0, %arg1 : i32, i32
  }
  func.func @transform_5(%arg0: i32, %arg1: i32, %arg2: i32) -> (i32, i32) {
    %c0_i32 = arith.constant 0 : i32
    return %arg0, %arg1 : i32, i32
  }
}

</mosaic_0001>

<bundles_post_ra>
// kernel: tpu_custom_call.1
= control target key start
LH: loop header
LB: loop body
LE: loop exit
PB: predicated region body
PF: predicated region fallthrough
CT: control target
= control target key end

     0   :  { %s1194_s0 = inlined_call_operand.hbm [shape: f32[16,128], index: 0, kind: input, shape index: {}]   ;;  %s1195_s1 = inlined_call_operand.hbm [shape: f32[16,128], index: 1, kind: input, shape index: {}]   ;;  %s1196_s2 = inlined_call_operand.hbm [shape: f32[128,128], index: 2, kind: input, shape index: {}]   ;;  %s1197_s3 = inlined_call_operand.vmem [shape: f32[1,128], index: 3, kind: input, shape index: {}]   ;;  %s1198_s4 = inlined_call_operand.hbm [shape: f32[16,128], index: 4, kind: input, shape index: {}]   ;;  %s1199_s5 = inlined_call_operand.hbm [shape: f32[16,128], index: 5, kind: output, shape index: {}]  }
   0x1   :  { %1206 = sst [smem:[#allocation23_spill]] %s1194_s0 }
   0x2   :  { %1207 = sst [smem:[#allocation24_spill]] %s1196_s2 }
   0x3   :  { %10 = vsyncpa [#allocation4], 0 }
   0x4   :  { %12 = vsyncpa [#allocation4 + $0x1], 0 }
   0x5   :  { %13 = vsyncpa [#allocation7], 0 }
   0x6   :  { %15 = vsyncpa [#allocation7 + $0x1], 0 }
   0x7   :  { %16 = vsyncpa [#allocation10], 0 }
   0x8   :  { %18 = vsyncpa [#allocation10 + $0x1], 0 }
   0x9   :  { %19 = vsyncpa [#allocation5], 0 }
   0xa   :  { %21 = vsyncpa [#allocation5 + $0x1], 0  ;;  %s1006_s18 = smov 0   ;;  %s1008_s19 = smov 0  }
   0xb   :  { %s1010_s20 = smov 0   ;;  %s1012_s21 = smov 0  }
   0xc   :  { %s1014_s22 = smov 0   ;;  %s1016_s23 = smov 0  }
   0xd LB: > { %1208 = sst [smem:[#allocation17_spill]] %s959_s20  ;;  %s1037_s24 = sadd.s32 4294967295, %s971_s23   ;;  %s971_s23 = sphi %s1016_s23, %s27_s23   ;;  %s967_s22 = sphi %s1014_s22, %s1227_s22   ;;  %s963_s21 = sphi %s1012_s21, %s1226_s21   ;;  %s959_s20 = sphi %s1010_s20, %s1225_s20   ;;  %s955_s19 = sphi %s1008_s19, %s1229_s19   ;;  %s951_s18 = sphi %s1006_s18, %s1228_s18  }
   0xe   : > { %1209 = sst [smem:[#allocation18_spill]] %s967_s22  ;;  %p646_p0 = scmp.ge.s32.totalorder %s971_s23, 1 }
   0xf   : > { %1210 = sst [smem:[#allocation19_spill]] %s971_s23  ;;  %p69_p1 = scmp.eq.s32.totalorder %s1037_s24, 0 }
  0x10   : > { %p217_p2 = scmp.lt.s32.totalorder %s971_s23, 3  ;;  %s1211_s2 = sld [smem:[#allocation24_spill]] }
  0x11   : > { %s973_s29 = smov [#allocation8]   ;;  %p649_p6 = scmp.ge.s32.totalorder %s971_s23, 2 }
  0x12   : > { %p1045_p3 = pnand %p646_p0, %p217_p2  ;;  %s234_s30 = sshll.u32 %s973_s29, 4  ;;  %s235_s30 = int_to_ptr.vmem [resolvable:$true] %s234_s30 }
  0x13   : > { %s974_s6 = smov 128   ;;  %s975_s7 = smov 8  }
  0x14   : > { %p679_p4 = pneg %p1045_p3  ;;  %s645_s8 = sadd.s32 4294967294, %s971_s23  }
  0x15   : > { %s46_s9 = sadd.s32 1, %s967_s22  ;;  %s55_s10 = sadd.s32 1, %s959_s20 }
  0x16   : > { %s232_s27 = sshll.u32 %s1211_s2, 4  ;;  %p680_p5 = pnand %p679_p4, %p69_p1  ;;  %s233_s27 = int_to_ptr.hbm [resolvable:$true] %s232_s27 }
  0x17   : > { %p48_p7 = scmp.ge.s32.totalorder %s46_s9, 2  ;;  %p62_p8 = scmp.ne.s32.totalorder %s959_s20, %s955_s19 }
  0x18   : > { %682 = dma.hbm_to_vmem [thread:$0]  (!%p680_p5), %s233_s27, 2048, %s235_s30, [#allocation7], %s974_s6, %s974_s6, %s975_s7  }
  0x19   : > { %p63_p9 = scmp.eq.s32.totalorder %s971_s23, 0  ;;  %p68_p10 = scmp.ne.s32.totalorder %s955_s19, %s951_s18 }
  0x1a   : > { %s1231_s9 = smov (%p48_p7, %s46_s9), 0  ;;  %p204_p13 = scmp.eq.s32.totalorder %s1037_s24, 1 }
  0x1b   : > { %1213 = sst [smem:[#allocation20_spill]] %s1231_s9  ;;  %p1064_p11 = por %p63_p9, %p62_p8 }
  0x1c   : > { %p1070_p12 = por %p69_p1, %p68_p10  ;;  %s50_s13 = ssub.s32 %s967_s22, %s1231_s9 }
  0x1d   : > { %p53_p0 = scmp.eq.s32.totalorder %s50_s13, 0  ;;  %p210_p2 = scmp.eq.s32.totalorder %s645_s8, 1 }
  0x1e   : > { %p1077_p4 = por %p204_p13, %p62_p8  ;;  %p698_p5 = scmp.lt.s32.totalorder %s971_s23, 2 }
  0x1f   : > { %s1083_s15 = scalar_select %p53_p0, %s959_s20, %s55_s10  }
  0x20   : > { %p1085_p7 = por %p210_p2, %p68_p10  ;;  %s1090_s17 = sand.u32 1, %s959_s20  }
  0x21   : > { %1217 = sst [smem:[#allocation21_spill]] %s1083_s15  ;;  %s650_s25 = sshll.u32 %s1090_s17, 3 }
  0x22   : > { %s1218_s16 = scalar_select %p1085_p7, 1, 0 }
  0x23   : > { %s651_s26 = sshll.u32 %s967_s22, 3  ;;  %s1220_s0 = sld [smem:[#allocation23_spill]] }
  0x24   : > { %1219 = sst [smem:[#allocation22_spill]] %s1218_s16  ;;  %s258_s6 = scalar_lea.vmem [#allocation3], %s650_s25 }
  0x25   : > { %s267_s7 = sshll.u32 %s258_s6, 4  ;;  %p1099_p8 = pnand %p698_p5, %p1064_p11  ;;  %s268_s7 = int_to_ptr.vmem [resolvable:$true] %s267_s7 }
  0x26   : > { %s274_s13 = sand.u32 1, %s971_s23   ;;  %s255_s2 = scalar_lea.sflag [#allocation4], %s1090_s17 }
  0x27   : > { %s283_s29 = scalar_lea.hbm %s1195_s1, %s651_s26  ;;  %s275_s11 = scalar_lea.sflag [#allocation7], %s274_s13 }
  0x28   : > { %s303_s20 = scalar_lea.hbm %s1198_s4, %s651_s26  ;;  %s298_s16 = scalar_lea.vmem [#allocation9], %s650_s25 }
  0x29   : > { %s263_s30 = scalar_lea.hbm %s1220_s0, %s651_s26  ;;  %s285_s0 = sshll.u32 %s283_s29, 4  ;;  %s286_s0 = int_to_ptr.hbm [resolvable:$true] %s285_s0 }
  0x2a   : > { %s265_s8 = sshll.u32 %s263_s30, 4  ;;  %s278_s30 = scalar_lea.vmem [#allocation6], %s650_s25  ;;  %s266_s8 = int_to_ptr.hbm [resolvable:$true] %s265_s8 }
  0x2b   : > { %686 = dma.hbm_to_vmem [thread:$0]  (!%p1099_p8), %s266_s8, 128, %s268_s7, %s255_s2  }
  0x2c   : > { %s287_s6 = sshll.u32 %s278_s30, 4  ;;  %s305_s23 = sshll.u32 %s303_s20, 4  ;;  %s288_s6 = int_to_ptr.vmem [resolvable:$true] %s287_s6  ;;  %s306_s23 = int_to_ptr.hbm [resolvable:$true] %s305_s23 }
  0x2d   : > { %689 = dma.hbm_to_vmem [thread:$0]  (!%p1099_p8), %s286_s0, 128, %s288_s6, %s275_s11  }
  0x2e   : > { %s307_s2 = sshll.u32 %s298_s16, 4  ;;  %s295_s9 = scalar_lea.sflag [#allocation10], %s1090_s17  ;;  %s308_s2 = int_to_ptr.vmem [resolvable:$true] %s307_s2 }
  0x2f   : > { %692 = dma.hbm_to_vmem [thread:$0]  (!%p1099_p8), %s306_s23, 128, %s308_s2, %s295_s9  }
  0x30   : > { %316 = sbr.rel (%p1045_p3) target bundleno = 258 (0x102), region = 40  ;;  %s1121_s7 = sand.u32 (!%p1045_p3), 1, %s955_s19  }
  0x31   : > { %s1124_s0 = sshll.u32 (!%p1045_p3), %s1121_s7, 3  ;;  %s319_s20 = scalar_lea.sflag (!%p1045_p3), [#allocation4], %s1121_s7 }
  0x32   : > { %s322_s22 = scalar_lea.vmem (!%p1045_p3), [#allocation3], %s1124_s0 }
  0x35   : > { %930 = dma.done.wait (%p1070_p12), %s319_s20, 128  }
  0x36   : > { %932 = vsyncadd (%p1070_p12), %s319_s20, 4294967168  ;;  %s328_s23 = sand.u32 1, %s1037_s24   ;;  %s332_s15 = scalar_lea.vmem [#allocation6], %s1124_s0 }
  0x37   : > { %s329_s28 = scalar_lea.sflag [#allocation7], %s328_s23 }
  0x38   : > { %934 = dma.done.wait (%p1070_p12), %s329_s28, 128  }
  0x39   : > { %936 = vsyncadd (%p1070_p12), %s329_s28, 4294967168 }
  0x3a   : > { %938 = dma.done.wait (%p69_p1), [#allocation7], 2048  }
  0x3b   : > { %940 = vsyncadd (%p69_p1), [#allocation7], 4294965248  ;;  %s344_s16 = scalar_lea.sflag [#allocation10], %s1121_s7  ;;  %s347_s17 = scalar_lea.vmem [#allocation9], %s1124_s0 }
  0x3c   : > { %942 = dma.done.wait (%p1070_p12), %s344_s16, 128  }
  0x3d   : > { %944 = vsyncadd (%p1070_p12), %s344_s16, 4294967168  ;;  %v435_v0 = vld [vmem:[#allocation8 + $0x78] sm:$0xff]  ;;  %v434_v1 = vld [vmem:[#allocation8 + $0x70] sm:$0xff]  ;;  %s664_s24 = sshll.u32 %s963_s21, 3  ;;  %s387_s13 = scalar_lea.vmem [#allocation11], %s1124_s0 }
  0x3e   : > { %437 = vmatpush.xpose.msra.mxu0 %v435_v0  ;;  %v397_v2 = vld [vmem:[%s322_s22] sm:$0xff]  ;;  %v431_v6 = vld [vmem:[#allocation8 + $0x58] sm:$0xff]  ;;  %v430_v8 = vld [vmem:[#allocation8 + $0x50] sm:$0xff]  ;;  %s483_s10 = scalar_lea.hbm %s1199_s5, %s664_s24  ;;  %s485_s27 = sshll.u32 %s387_s13, 4  ;;  %s486_s27 = int_to_ptr.vmem [resolvable:$true] %s485_s27 }
  0x3f   : > { %v433_v3 = vld [vmem:[#allocation8 + $0x68] sm:$0xff]  ;;  %v662_v4 = vmul.f32 -1.442695, %v397_v2  ;;  %v432_v5 = vld [vmem:[#allocation8 + $0x60] sm:$0xff]  ;;  %v427_v12 = vld [vmem:[#allocation8 + $0x38] sm:$0xff]  ;;  %s487_s29 = sshll.u32 %s483_s10, 4  ;;  %s488_s29 = int_to_ptr.hbm [resolvable:$true] %s487_s29 }
  0x40   : > { %v429_v10 = vld [vmem:[#allocation8 + $0x48] sm:$0xff]  ;;  %v428_v11 = vld [vmem:[#allocation8 + $0x40] sm:$0xff]  ;;  %v426_v14 = vld [vmem:[#allocation8 + $0x30] sm:$0xff]  ;;  %s472_s21 = scalar_lea.sflag [#allocation5], %s1121_s7  ;;  %s891_s30 = sshra.s32 %s488_s29, 4  ;;  %s892_s30 = int_to_ptr.hbm [resolvable:$true] %s891_s30 }
  0x41   : > { %753 = vpow2.f32 %v662_v4  ;;  %v425_v16 = vld [vmem:[#allocation8 + $0x28] sm:$0xff]  ;;  %v424_v18 = vld [vmem:[#allocation8 + $0x20] sm:$0xff]  ;;  %v423_v21 = vld [vmem:[#allocation8 + $0x18] sm:$0xff]  ;;  %s893_s6 = scalar_lea.hbm %s892_s30, 8  ;;  %s897_s9 = scalar_lea.hbm %s1199_s5, 16 }
  0x42   : > { %438 = vmatpush.xpose.msra.mxu0 %v434_v1  ;;  %v422_v25 = vld [vmem:[#allocation8 + $0x10] sm:$0xff]  ;;  %v421_v28 = vld [vmem:[#allocation8 + $0x8] sm:$0xff]  ;;  %v420_v31 = vld [vmem:[#allocation8] sm:$0xff]  ;;  %p894_p1 = scmp.ne.s32.totalorder %s892_s30, %s893_s6  ;;  %p898_p10 = scmp.lt.s32.totalorder %s892_s30, %s1199_s5 }
  0x43   : > { %v398_v30 = vld [vmem:[%s332_s15] sm:$0xff]  ;;  %v752_v33 = vld [vmem:[%s1197_s3] ss:$0 sm:$0xff]  ;;  %p899_p11 = scmp.lt.s32.totalorder %s897_s9, %s893_s6 }
  0x44   : > { %v468_v35 = vld [vmem:[%s347_s17] sm:$0xff]  ;;  %p895_p3 = pnand %p894_p1, %p1077_p4 }
  0x45   : > { %p900_p12 = por %p899_p11, %p898_p10 }
  0x46   : > { %439 = vmatpush.xpose.msra.mxu0 %v433_v3  ;;  %p896_p9 = pneg %p895_p3 }
  0x47   : > { %v754_v7 = vpop.eup %753 }
  0x48   : > { %v402_v9 = vadd.f32 1.0, %v754_v7  ;;  %p901_p13 = pnand %p900_p12, %p896_p9 }
  0x4a   : > { %440 = vmatpush.xpose.msra.mxu0 %v432_v5  ;;  %755 = vrcp.f32 %v402_v9  ;;  %vm408_vm0 = vweird.f32 %v402_v9  ;;  %v414_v20 = vand.u32 2147483648, %v402_v9  ;;  %v412_v23 = vand.u32 2147483647, %v402_v9 }
  0x4c   : > { %v415_v24 = vor.u32 1.1754944e-38, %v414_v20  ;;  %vm413_vm3 = vcmp.eq.f32.partialorder %v412_v23, 8.507059e+37 }
  0x4e   : > { %441 = vmatpush.xpose.msra.mxu0 %v431_v6 }
  0x50   : > { %v756_v13 = vpop.eup %755 }
  0x51   : > { %v404_v15 = vmul.f32 %v756_v13, %v402_v9  ;;  %vm409_vm1 = vweird.f32 %v756_v13 }
  0x52   : > { %442 = vmatpush.xpose.msra.mxu0 %v430_v8  ;;  %vm410_vm2 = vmor %vm408_vm0, %vm409_vm1 }
  0x53   : > { %v405_v17 = vsub.f32 1.0, %v404_v15 }
  0x55   : > { %v406_v19 = vmul.f32 %v756_v13, %v405_v17 }
  0x56   : > { %443 = vmatpush.xpose.msra.mxu0 %v429_v10 }
  0x57   : > { %v407_v22 = vadd.f32 %v756_v13, %v406_v19 }
  0x59   : > { %v411_v26 = vsel %vm410_vm2, %v756_v13, %v407_v22 }
  0x5a   : > { %444 = vmatpush.xpose.msra.mxu0 %v428_v11  ;;  %v416_v27 = vsel %vm413_vm3, %v415_v24, %v411_v26 }
  0x5b   : > { %v418_v29 = vmul.f32 %v416_v27, %v397_v2 }
  0x5d   : > { %v419_v32 = vmul.f32 %v418_v29, %v398_v30 }
  0x5e   : > { %445 = vmatpush.xpose.msra.mxu0 %v427_v12 }
  0x62   : > { %446 = vmatpush.xpose.msra.mxu0 %v426_v14 }
  0x66   : > { %447 = vmatpush.xpose.msra.mxu0 %v425_v16 }
  0x6a   : > { %448 = vmatpush.xpose.msra.mxu0 %v424_v18 }
  0x6e   : > { %449 = vmatpush.xpose.msra.mxu0 %v423_v21 }
  0x72   : > { %450 = vmatpush.xpose.msra.mxu0 %v422_v25 }
  0x76   : > { %451 = vmatpush.xpose.msra.mxu0 %v421_v28 }
  0x7a   : > { %452 = vmatpush.xpose.msra.mxu0 %v420_v31 }
  0x7d   : > { %453 = vmatmul.f32.vlgmr.msra.gmra.mxu0 %v419_v32 }
  0xfa   : > { %v454_v34 = vpop.f32.mrf.mxu0 }
  0xfb   : > { %v467_v36 = vadd.f32 %v752_v33, %v454_v34 }
  0xfd   : > { %v469_v37 = vadd.f32 %v468_v35, %v467_v36 }
  0xff   : > { %470 = vst [vmem:[%s387_s13] sm:$0xff] %v469_v37 }
 0x100   : > { %904 = shalt.err (!%p901_p13)
}
 0x101   : > { %677 = dma.vmem_to_hbm [thread:$0]  (%p1077_p4), %s486_s27, 128, %s488_s29, %s472_s21  }
 0x102 PF: > { %s1223_s22 = sld [smem:[#allocation19_spill]]  ;;  %s499_s23 = sand.u32 1, %s951_s18  }
 0x103   : > { %p694_p0 = pnand %p649_p6, %p1085_p7  ;;  %s500_s28 = scalar_lea.sflag [#allocation5], %s499_s23 }
 0x105   : > { %p695_p2 = pneg %p694_p0 }
 0x107   : > { %946 = dma.done.wait (%p695_p2), %s500_s28, 128  }
 0x108   : > { %948 = vsyncadd (%p695_p2), %s500_s28, 4294967168  ;;  %s27_s23 = sadd.s32 1, %s1223_s22   ;;  %s1224_s15 = sld [smem:[#allocation17_spill]] }
 0x109   : > { %p24_p5 = scmp.ge.s32.totalorder %s27_s23, 4   ;;  %s1225_s20 = sld [smem:[#allocation21_spill]] }
 0x10a   : > { %s1226_s21 = sld [smem:[#allocation18_spill]]  ;;  %s1228_s18 = smov %s955_s19 }
 0x10b   : > { %s1227_s22 = sld [smem:[#allocation20_spill]]  ;;  %26 = sbr.rel (!%p24_p5) target bundleno = 13 (0xd), region = 127 }
 0x10e   : > { %s1229_s19 = smov %s1224_s15 }
 0x110   :  { %506 = vsyncpa [#allocation4], 1 }
 0x111   :  { %508 = vsyncpa [#allocation4 + $0x1], 1 }
 0x112   :  { %509 = vsyncpa [#allocation7], 1 }
 0x113   :  { %511 = vsyncpa [#allocation7 + $0x1], 1 }
 0x114   :  { %512 = vsyncpa [#allocation10], 1 }
 0x115   :  { %514 = vsyncpa [#allocation10 + $0x1], 1 }
 0x116   :  { %515 = vsyncpa [#allocation5], 1 }
 0x117   :  { %517 = vsyncpa [#allocation5 + $0x1], 1 }

</bundles_post_ra>
